<compile_context>
chip_gen: v6e
topology: v6e:2x2x1
jax: 0.10.0
libtpu: 0.0.40
codegen_flags: <defaults>
</compile_context>

<pallas_src>
import jax
import jax.numpy as jnp
from jax.experimental import pallas as pl
from jax.experimental.pallas import tpu as pltpu

_MIB = 1024 * 1024


# --------------------------------------------------------------------------- #
# Kernel
# --------------------------------------------------------------------------- #
def _fused_classifier_head_kernel(ids_ref, emb_hbm, w_ref, b_ref, out_ref,
                                  h_buf, sem):
    """One batch tile of  log_softmax(emb[last_ids] @ W + b).

    ids_ref : SMEM [num_tiles*TB] int32  (scalar prefetch; last-token row ids)
    emb_hbm : HBM  [V, D]                (memory_space=pl.ANY; gathered by DMA)
    w_ref   : VMEM [D, L_pad]            (resident across tiles)
    b_ref   : VMEM [1, L_pad] f32        (padded labels carry -1e30)
    out_ref : VMEM [TB, L_pad] f32
    h_buf   : VMEM scratch [TB, D]       (gathered hidden-state tile)
    sem     : single DMA semaphore shared by all row-gather copies
    """
    i = pl.program_id(0)
    tb = h_buf.shape[0]

    # --- Gather this tile's last-token rows straight from HBM. --------------
    @pl.loop(0, tb)
    def _issue(r):
        row = ids_ref[i * tb + r]
        pltpu.make_async_copy(emb_hbm.at[row], h_buf.at[r], sem).start()

    @pl.loop(0, tb)
    def _drain(r):
        # One wait per issued copy; the shared semaphore counts total bytes.
        pltpu.make_async_copy(emb_hbm.at[0], h_buf.at[r], sem).wait()

    # --- Classifier head on the MXU (f32 accumulation, no input up-cast). ---
    logits = jnp.dot(h_buf[...], w_ref[...], preferred_element_type=jnp.float32)
    logits = logits + b_ref[...]

    # --- Numerically-stable log-softmax over the lane-padded label axis. ----
    # Padded columns carry a -1e30 bias: they never win the max nor add to
    # the sum-exp, and are sliced away by the wrapper.
    m = jnp.max(logits, axis=-1, keepdims=True)
    shifted = logits - m
    lse = jnp.log(jnp.sum(jnp.exp(shifted), axis=-1, keepdims=True))
    out_ref[...] = (shifted - lse).astype(out_ref.dtype)


# --------------------------------------------------------------------------- #
# Helpers
# --------------------------------------------------------------------------- #
def _vmem_capacity_bytes():
    """Physical VMEM capacity of the current chip (conservative fallback)."""
    try:
        return int(pltpu.get_tpu_info().vmem_capacity_bytes)
    except Exception:
        return 64 * _MIB  # v7x per-TensorCore capacity: safe everywhere.


def _resident_spec(block_shape, index_map):
    """BlockSpec for an operand with a constant index_map: it is DMA'd once;
    when supported, keep it in a single VMEM buffer instead of the default 2."""
    if hasattr(pl, "Buffered"):
        try:
            return pl.BlockSpec(block_shape, index_map,
                                pipeline_mode=pl.Buffered(1))
        except TypeError:
            pass
    return pl.BlockSpec(block_shape, index_map)


def _pick_batch_tile(B, D, L_pad, h_itemsize, capacity):
    """Generation-aware batch-tile size.

    Budget ~capacity/4 for the per-tile gather buffer + double-buffered output
    (32 MiB on 128 MiB v5e/v6e, 16 MiB on 64 MiB v7x).  Tiles are aligned to
    the dtype's packed-sublane count, and for B > 16 capped at ceil(B/2) so
    the single "parallel" grid axis yields >= 2 tiles (both v7x TensorCores)."""
    align = max(8, 32 // max(1, h_itemsize))        # f32: 8, bf16: 16, int8: 32
    per_row = D * h_itemsize + 2 * L_pad * 4        # gather row + 2x out row
    budget = max(8 * _MIB, capacity // 4)
    tb = max(align, min(2048, budget // per_row))
    if B > 16:
        half = -(-((B + 1) // 2) // align) * align  # round_up(ceil(B/2), align)
        tb = min(tb, half)
    if tb >= B:
        return B
    return max(align, (tb // align) * align)


def prepare_classifier_params(tok_emb, cls_w, cls_b, compute_dtype=None):
    """One-time parameter prep (NOT per forward call).

    Lane-pads the label axis to a multiple of 128: padded W columns are zero,
    padded bias entries are -1e30 (bias is kept in f32 so the sentinel is
    exact).  Optionally down-casts embeddings/W to `compute_dtype` (e.g. bf16)
    to halve the gather traffic of the mem-bound path."""
    if compute_dtype is not None:
        tok_emb = tok_emb.astype(compute_dtype)
        cls_w = cls_w.astype(compute_dtype)
    D, L = cls_w.shape
    L_pad = ((L + 127) // 128) * 128
    if L_pad != L:
        w_p = jnp.zeros((D, L_pad), dtype=cls_w.dtype).at[:, :L].set(cls_w)
        b_p = jnp.full((1, L_pad), -1e30, dtype=jnp.float32).at[0, :L].set(
            cls_b.astype(jnp.float32))
    else:
        w_p = cls_w
        b_p = cls_b.reshape(1, L).astype(jnp.float32)
    return {"tok_emb": tok_emb, "w_pad": w_p, "b_pad": b_p, "num_labels": L}


# --------------------------------------------------------------------------- #
# Pallas-call wrapper
# --------------------------------------------------------------------------- #
def classifier_head_log_softmax(last_ids, tok_emb, w_pad, b_pad, num_labels):
    """log_softmax(tok_emb[last_ids] @ W + b) -> [B, num_labels] f32."""
    B = int(last_ids.shape[0])
    V, D = tok_emb.shape
    L_pad = w_pad.shape[1]

    capacity = _vmem_capacity_bytes()
    tb = _pick_batch_tile(B, D, L_pad, tok_emb.dtype.itemsize, capacity)
    num_tiles = -(-B // tb)
    ids_len = num_tiles * tb

    ids = last_ids.astype(jnp.int32)
    if ids_len != B:
        # Pad with row 0 so tail-tile gathers stay in bounds; the corresponding
        # output rows fall outside [B, L_pad] and are dropped by Pallas.
        ids = jnp.pad(ids, (0, ids_len - B))

    # VMEM footprint: resident W + bias, gather scratch, double-buffered out
    # tile.  Clamp the limit safely below the chip's physical VMEM.
    needed = (D * L_pad * w_pad.dtype.itemsize
              + L_pad * 4
              + tb * D * tok_emb.dtype.itemsize
              + 2 * tb * L_pad * 4)
    vmem_limit = int(min(capacity - 8 * _MIB, max(2 * needed, needed + 4 * _MIB)))
    vmem_limit = int(max(vmem_limit, min(capacity, needed + 2 * _MIB)))

    cost = pl.CostEstimate(
        flops=2 * B * D * L_pad,
        transcendentals=B * L_pad,
        bytes_accessed=(B * D * tok_emb.dtype.itemsize
                        + D * L_pad * w_pad.dtype.itemsize
                        + B * L_pad * 4),
    )

    grid_spec = pltpu.PrefetchScalarGridSpec(
        num_scalar_prefetch=1,
        grid=(num_tiles,),
        in_specs=[
            pl.BlockSpec(memory_space=pl.ANY),                      # emb: stays in HBM
            _resident_spec((D, L_pad), lambda i, ids_ref: (0, 0)),  # W: VMEM-resident
            _resident_spec((1, L_pad), lambda i, ids_ref: (0, 0)),  # b: VMEM-resident
        ],
        out_specs=pl.BlockSpec((tb, L_pad), lambda i, ids_ref: (i, 0)),
        scratch_shapes=[
            pltpu.VMEM((tb, D), tok_emb.dtype),   # gathered hidden-state tile
            pltpu.SemaphoreType.DMA,              # one sem shared by all gathers
        ],
    )

    out_padded = pl.pallas_call(
        _fused_classifier_head_kernel,
        out_shape=jax.ShapeDtypeStruct((B, L_pad), jnp.float32),
        grid_spec=grid_spec,
        compiler_params=pltpu.CompilerParams(
            dimension_semantics=("parallel",),
            vmem_limit_bytes=vmem_limit,
        ),
        cost_estimate=cost,
    )(ids, tok_emb, w_pad, b_pad)

    return out_padded[:, :num_labels]


def llama_embedding_classifier_forward(input_ids, prepared):
    """Mirrors LlamaEmbeddingClassifier.forward (eval mode)."""
    # TODO(synk): the pretrained Llama transformer backbone is not reproduced;
    # it is stood in by a deterministic token-embedding lookup, so the last
    # token's hidden state is tok_emb[input_ids[:, -1]].  Dropout = identity.
    last_ids = input_ids[:, -1]
    return classifier_head_log_softmax(
        last_ids, prepared["tok_emb"], prepared["w_pad"], prepared["b_pad"],
        prepared["num_labels"])


# --------------------------------------------------------------------------- #
# Reference + test
# --------------------------------------------------------------------------- #
def _reference(input_ids, tok_emb, cls_w, cls_b):
    hidden = jnp.take(tok_emb, input_ids[:, -1], axis=0)
    logits = jnp.dot(hidden, cls_w, precision=jax.lax.Precision.HIGHEST) + cls_b
    return jax.nn.log_softmax(logits, axis=-1)


if __name__ == "__main__":
    # Small synthetic config: batch=2, seq=8, hidden=32, vocab=64, num_labels=8
    B, T, D, V, L = 2, 8, 32, 64, 8

    key = jax.random.PRNGKey(0)
    k_emb, k_w, k_b, k_ids, k_ids2 = jax.random.split(key, 5)

    tok_emb = jax.random.normal(k_emb, (V, D), dtype=jnp.float32) * 0.02
    cls_w = jax.random.normal(k_w, (D, L), dtype=jnp.float32) * 0.02
    cls_b = jax.random.normal(k_b, (L,), dtype=jnp.float32) * 0.01
    prepared = prepare_classifier_params(tok_emb, cls_w, cls_b)

    # Test 1: tiny single-tile batch.
    input_ids = jax.random.randint(k_ids, (B, T), 0, V, dtype=jnp.int32)
    out = jax.block_until_ready(
        llama_embedding_classifier_forward(input_ids, prepared))
    ref = _reference(input_ids, tok_emb, cls_w, cls_b)
    assert out.shape == (B, L)
    assert jnp.allclose(out, ref, atol=1e-4, rtol=1e-4), "mismatch vs reference (B=2)"
    assert jnp.allclose(jnp.sum(jnp.exp(out), axis=-1), 1.0, atol=1e-5)

    # Test 2: multi-tile grid with a partial last tile (B=20 -> two tiles of 16).
    B2 = 20
    input_ids2 = jax.random.randint(k_ids2, (B2, T), 0, V, dtype=jnp.int32)
    out2 = jax.block_until_ready(
        llama_embedding_classifier_forward(input_ids2, prepared))
    ref2 = _reference(input_ids2, tok_emb, cls_w, cls_b)
    assert out2.shape == (B2, L)
    assert jnp.allclose(out2, ref2, atol=1e-4, rtol=1e-4), "mismatch vs reference (B=20)"
    assert jnp.allclose(jnp.sum(jnp.exp(out2), axis=-1), 1.0, atol=1e-5)

    print("KERNEL_OK")
</pallas_src>

<mosaic_0001>
module attributes {stable_mosaic.version = 11 : i64} {
  func.func @_fused_classifier_head_kernel(%arg0: i32, %arg1: memref<2xi32, #tpu.memory_space<smem>>, %arg2: memref<64x32xf32, #tpu.memory_space<any>>, %arg3: memref<32x128xf32, #tpu.memory_space<vmem>>, %arg4: memref<1x128xf32, #tpu.memory_space<vmem>>, %arg5: memref<2x128xf32, #tpu.memory_space<vmem>>, %arg6: memref<2x32xf32, #tpu.memory_space<vmem>>, %arg7: memref<!tpu.dma_semaphore, #tpu.memory_space<semaphore_mem>>) attributes {dimension_semantics = [#tpu.dimension_semantics<parallel>], iteration_bounds = array<i64: 1>, scalar_prefetch = 1 : i64, scratch_operands = 2 : i64, tpu.core_type = #tpu.core_type<tc>, window_params = [{}, {pipeline_mode = #tpu.pipeline_mode<synchronous>, transform_indices = @transform_1, window_bounds = array<i64: 32, 128>}, {pipeline_mode = #tpu.pipeline_mode<synchronous>, transform_indices = @transform_2, window_bounds = array<i64: 1, 128>}, {transform_indices = @transform_3, window_bounds = array<i64: 2, 128>}]} {
    %c0_i32 = arith.constant 0 : i32
    %c2_i32 = arith.constant 2 : i32
    %0 = arith.addi %c0_i32, %c2_i32 : i32
    %c1_i32 = arith.constant 1 : i32
    scf.for %arg8 = %c0_i32 to %0 step %c1_i32  : i32 {
      %c1_i32_14 = arith.constant 1 : i32
      %19 = arith.muli %arg8, %c1_i32_14 : i32
      %c0_i32_15 = arith.constant 0 : i32
      %20 = arith.addi %c0_i32_15, %19 : i32
      %c2_i32_16 = arith.constant 2 : i32
      %21 = arith.muli %arg0, %c2_i32_16 : i32
      %22 = arith.addi %21, %20 : i32
      %23 = arith.index_cast %22 : i32 to index
      %24 = memref.load %arg1[%23] : memref<2xi32, #tpu.memory_space<smem>>
      %c0_i32_17 = arith.constant 0 : i32
      %25 = tpu.memref_slice %arg2[%24, %c0_i32_17] : memref<64x32xf32, #tpu.memory_space<any>> -> memref<1x32xf32, #tpu.memory_space<any>>
      %26 = tpu.memref_squeeze %25 : memref<1x32xf32, #tpu.memory_space<any>> -> memref<32xf32, #tpu.memory_space<any>>
      %c0_i32_18 = arith.constant 0 : i32
      %27 = tpu.memref_slice %arg6[%20, %c0_i32_18] : memref<2x32xf32, #tpu.memory_space<vmem>> -> memref<1x32xf32, #tpu.memory_space<vmem>>
      %28 = tpu.memref_squeeze %27 : memref<1x32xf32, #tpu.memory_space<vmem>> -> memref<32xf32, #tpu.memory_space<vmem>>
      tpu.enqueue_dma source(%26 : memref<32xf32, #tpu.memory_space<any>>) target(%28 : memref<32xf32, #tpu.memory_space<vmem>>) target_semaphore(%arg7 : memref<!tpu.dma_semaphore, #tpu.memory_space<semaphore_mem>>)
    }
    %c2_i32_0 = arith.constant 2 : i32
    %c0_i32_1 = arith.constant 0 : i32
    %c2_i32_2 = arith.constant 2 : i32
    %1 = arith.addi %c0_i32_1, %c2_i32_2 : i32
    %c1_i32_3 = arith.constant 1 : i32
    scf.for %arg8 = %c0_i32_1 to %1 step %c1_i32_3  : i32 {
      %c1_i32_14 = arith.constant 1 : i32
      %19 = arith.muli %arg8, %c1_i32_14 : i32
      %c0_i32_15 = arith.constant 0 : i32
      %20 = arith.addi %c0_i32_15, %19 : i32
      %c0_i32_16 = arith.constant 0 : i32
      %c0_i32_17 = arith.constant 0 : i32
      %21 = tpu.memref_slice %arg2[%c0_i32_16, %c0_i32_17] : memref<64x32xf32, #tpu.memory_space<any>> -> memref<1x32xf32, #tpu.memory_space<any>>
      %22 = tpu.memref_squeeze %21 : memref<1x32xf32, #tpu.memory_space<any>> -> memref<32xf32, #tpu.memory_space<any>>
      %c0_i32_18 = arith.constant 0 : i32
      %23 = tpu.memref_slice %arg6[%20, %c0_i32_18] : memref<2x32xf32, #tpu.memory_space<vmem>> -> memref<1x32xf32, #tpu.memory_space<vmem>>
      %24 = tpu.memref_squeeze %23 : memref<1x32xf32, #tpu.memory_space<vmem>> -> memref<32xf32, #tpu.memory_space<vmem>>
      tpu.wait_dma2 semaphore(%arg7 : memref<!tpu.dma_semaphore, #tpu.memory_space<semaphore_mem>>) src(%22 : memref<32xf32, #tpu.memory_space<any>>) dst(%24 : memref<32xf32, #tpu.memory_space<vmem>>)
    }
    %c2_i32_4 = arith.constant 2 : i32
    %c0 = arith.constant 0 : index
    %c0_5 = arith.constant 0 : index
    %2 = vector.load %arg6[%c0, %c0_5] : memref<2x32xf32, #tpu.memory_space<vmem>>, vector<2x32xf32>
    %c0_6 = arith.constant 0 : index
    %c0_7 = arith.constant 0 : index
    %3 = vector.load %arg3[%c0_6, %c0_7] : memref<32x128xf32, #tpu.memory_space<vmem>>, vector<32x128xf32>
    %cst = arith.constant dense<0.000000e+00> : vector<2x128xf32>
    %4 = tpu.matmul %2, %3, %cst {dimension_numbers = #tpu.dot_dimension_numbers<[1], [0], [0], [1], [0, 0, 1, 1], [], []>} : vector<2x32xf32>, vector<32x128xf32>, vector<2x128xf32> -> vector<2x128xf32>
    %c0_8 = arith.constant 0 : index
    %c0_9 = arith.constant 0 : index
    %5 = vector.load %arg4[%c0_8, %c0_9] : memref<1x128xf32, #tpu.memory_space<vmem>>, vector<1x128xf32>
    %6 = vector.broadcast %5 : vector<1x128xf32> to vector<2x128xf32>
    %7 = arith.addf %4, %6 : vector<2x128xf32>
    %cst_10 = arith.constant dense<0xFF800000> : vector<2xf32>
    %8 = vector.multi_reduction <maximumf>, %7, %cst_10 [1] : vector<2x128xf32> to vector<2xf32>
    %9 = vector.shape_cast %8 : vector<2xf32> to vector<2x1xf32>
    %10 = vector.broadcast %9 : vector<2x1xf32> to vector<2x128xf32>
    %11 = arith.subf %7, %10 : vector<2x128xf32>
    %12 = math.exp %11 : vector<2x128xf32>
    %cst_11 = arith.constant dense<0.000000e+00> : vector<2xf32>
    %13 = vector.multi_reduction <add>, %12, %cst_11 [1] : vector<2x128xf32> to vector<2xf32>
    %14 = vector.shape_cast %13 : vector<2xf32> to vector<2x1xf32>
    %15 = math.log %14 : vector<2x1xf32>
    %16 = vector.broadcast %15 : vector<2x1xf32> to vector<2x128xf32>
    %17 = arith.subf %11, %16 : vector<2x128xf32>
    %c0_12 = arith.constant 0 : index
    %c0_13 = arith.constant 0 : index
    %18 = vector.load %arg5[%c0_12, %c0_13] : memref<2x128xf32, #tpu.memory_space<vmem>>, vector<2x128xf32>
    tpu.vector_store %arg5[%c0_12, %c0_13], %17 {strides = array<i32>} : memref<2x128xf32, #tpu.memory_space<vmem>>, vector<2x128xf32>,
    return
  }
  func.func @transform_1(%arg0: i32, %arg1: memref<2xi32, #tpu.memory_space<smem>>) -> (i32, i32) {
    %c0_i32 = arith.constant 0 : i32
    %c0_i32_0 = arith.constant 0 : i32
    %c0_i32_1 = arith.constant 0 : i32
    return %c0_i32, %c0_i32_0 : i32, i32
  }
  func.func @transform_2(%arg0: i32, %arg1: memref<2xi32, #tpu.memory_space<smem>>) -> (i32, i32) {
    %c0_i32 = arith.constant 0 : i32
    %c0_i32_0 = arith.constant 0 : i32
    %c0_i32_1 = arith.constant 0 : i32
    return %c0_i32, %c0_i32_0 : i32, i32
  }
  func.func @transform_3(%arg0: i32, %arg1: memref<2xi32, #tpu.memory_space<smem>>) -> (i32, i32) {
    %c0_i32 = arith.constant 0 : i32
    %c0_i32_0 = arith.constant 0 : i32
    return %arg0, %c0_i32 : i32, i32
  }
}

</mosaic_0001>

<bundles_post_ra>
// kernel: tpu_custom_call.1
= control target key start
LH: loop header
LB: loop body
LE: loop exit
PB: predicated region body
PF: predicated region fallthrough
CT: control target
= control target key end

     0   :  { %s377_s0 = inlined_call_operand.vmem [shape: s32[2], index: 0, kind: input, shape index: {}]   ;;  %s378_s1 = inlined_call_operand.vmem [shape: f32[64,32], index: 1, kind: input, shape index: {}]   ;;  %s379_s2 = inlined_call_operand.vmem [shape: f32[32,128], index: 2, kind: input, shape index: {}]   ;;  %s380_s3 = inlined_call_operand.vmem [shape: f32[1,128], index: 3, kind: input, shape index: {}]   ;;  %s381_s4 = inlined_call_operand.hbm [shape: f32[2,128], index: 4, kind: output, shape index: {}]  }
   0x1   :  { %s9_s17 = sshll.u32 %s377_s0, 4  ;;  %s10_s17 = int_to_ptr.vmem [resolvable:$true] %s9_s17 }
   0x2   :  { %s270_s18 = scalar_lea.vmem %s10_s17, 16  ;;  %p275_p1 = scmp.lt.s32.totalorder %s10_s17, %s10_s17 }
   0x3   :  { %p271_p0 = scmp.ne.s32.totalorder %s10_s17, %s270_s18  ;;  %p276_p2 = scmp.lt.s32.totalorder %s270_s18, %s270_s18 }
   0x5   :  { %p277_p3 = por %p276_p2, %p275_p1 }
   0x7   :  { %p278_p4 = pnand %p277_p3, %p271_p0 }
   0x9   :  { %281 = shalt.err (!%p278_p4)  }
   0xa   :  { %s324_s19 = smov [#allocation5]  }
   0xb   :  { %12 = dma.vmem_to_smem %s10_s17, 16, %s324_s19, [#allocation4] }
   0xc   :  { %310 = dma.done.wait [#allocation4], 16 }
   0xd   :  { %311 = vsyncadd [#allocation4], 4294967280 }
   0xe   :  { %14 = sfence }
   0xf   :  { %15 = vsyncpa [#allocation7], 0  ;;  %s316_s20 = smov 0  }
  0x10 LB: > { %s28_s21 = sld [smem:[#allocation5 + %s318_s20]]  ;;  %s30_s24 = scalar_lea.vmem [#allocation2], %s318_s20  ;;  %s318_s20 = sphi %s316_s20, %s25_s20  }
  0x16   : > { %s29_s23 = scalar_lea.vmem %s378_s1, %s28_s21 }
  0x17   : > { %v49_v0 = vld [vmem:[%s29_s23] sm:$0x1] }
  0x18   : > { %50 = vst [vmem:[%s30_s24] sm:$0x1] %v49_v0 }
  0x19   : > { %76 = vsyncadd [#allocation3], 16  ;;  %s25_s20 = sadd.s32 1, %s318_s20  }
  0x1a   : > { %p22_p5 = scmp.ge.s32.totalorder %s25_s20, 2  }
  0x1b   :  { %s320_s25 = smov (%p22_p5), 0  }
  0x1c   :  { %24 = sbr.rel (!%p22_p5) target bundleno = 16 (0x10), region = 84 }
  0x21 LB: > { %312 = dma.done.wait [#allocation3], 16  ;;  %s322_s25 = sphi %s320_s25, %s82_s25  }
  0x22   : > { %313 = vsyncadd [#allocation3], 4294967280  ;;  %s82_s25 = sadd.s32 1, %s322_s25  }
  0x23   : > { %p79_p6 = scmp.ge.s32.totalorder %s82_s25, 2  }
  0x24   :  { %v89_v1 = vld [vmem:[%s379_s2 + $0x18] sm:$0xff] (%p79_p6)  ;;  %v325_v2 = vmov (%p79_p6), 0.0   ;;  %v88_v3 = vld [vmem:[%s379_s2 + $0x10] sm:$0xff] (%p79_p6)  ;;  %vm326_vm0 = vmmov (%p79_p6), 0   ;;  %v87_v4 = vld [vmem:[%s379_s2 + $0x8] sm:$0xff] (%p79_p6)  ;;  %vm97_vm1 = vcmask (%p79_p6), 261120  }
  0x25   :  { %81 = sbr.rel (!%p79_p6) target bundleno = 33 (0x21), region = 95  ;;  %235 = vmatprep.subr.mxu0 (%p79_p6), %v325_v2  ;;  %243 = vmatprep.mubr.msk.f32.mxu0 (%p79_p6), %vm326_vm0, %v325_v2  ;;  %v86_v5 = vld [vmem:[%s379_s2] sm:$0xff] (%p79_p6)  ;;  %vm171_vm2 = vcmask (%p79_p6), 1041408   ;;  %s327_s2 = smov (%p79_p6), [#allocation6]  }
  0x26   :  { %236 = vmatpush3.msra.mxu0 (%p79_p6), %v89_v1  ;;  %v85_v6 = vld [vmem:[#allocation2] sm:$0x3] (%p79_p6)  ;;  %s191_s9 = sshll.u32 (%p79_p6), %s327_s2, 4  ;;  %s192_s9 = int_to_ptr.vmem [resolvable:$true] %s191_s9 }
  0x27   :  { %237 = vmatprep.subr.mxu0 (%p79_p6), %v325_v2  ;;  %v227_v7 = vld [vmem:[%s380_s3] ss:$0 sm:$0xff] (%p79_p6)  ;;  %s282_s3 = scalar_lea.vmem (%p79_p6), %s192_s9, 32  ;;  %p287_p8 = scmp.lt.s32.totalorder (%p79_p6), %s192_s9, %s192_s9 }
  0x28   :  { %238 = vmatpush3.msra.mxu0 (%p79_p6), %v88_v3  ;;  %p283_p7 = scmp.ne.s32.totalorder (%p79_p6), %s192_s9, %s282_s3  ;;  %p288_p9 = scmp.lt.s32.totalorder (%p79_p6), %s282_s3, %s282_s3 }
  0x29   :  { %239 = vmatprep.subr.mxu0 (%p79_p6), %v325_v2 }
  0x2a   :  { %240 = vmatpush3.msra.mxu0 %v87_v4  ;;  %p289_p10 = por %p288_p9, %p287_p8 }
  0x2b   :  { %241 = vmatprep.subr.mxu0 %v325_v2 }
  0x2c   :  { %242 = vmatpush3.msra.mxu0 %v86_v5  ;;  %p290_p11 = pnand %p289_p10, %p283_p7 }
  0x2d   :  { %244 = vmatmul.mubr.msk.f32.vlgmr.msra.gmra.mxu0 %vm97_vm1, %v85_v6 }
  0xed   :  { %v167_v8 = vpop.f32.mrf.mxu0 }
  0xee   :  { %v168_v9 = vadd.f32 %v227_v7, %v167_v8 }
  0xef   :  { %v245_v10 = vpop.f32.mrf.mxu0 }
  0xf0   :  { %v172_v11 = vsel %vm171_vm2, %v168_v9, -inf }
  0xf1   :  { %173 = vmax.xlane.f32.xlu0 %v172_v11 }
 0x17a   :  { %v174_v12 = vpop.xlane.xlu0 %173 }
 0x17b   :  { %v175_v13 = vsub.f32 %v168_v9, %v174_v12 }
 0x17d   :  { %v176_v14 = vmul.f32 1.442695, %v175_v13 }
 0x17f   :  { %266 = vpow2.f32 %v176_v14 }
 0x18c   :  { %v267_v15 = vpop.eup %266 }
 0x18d   :  { %v178_v16 = vsel %vm171_vm2, %v267_v15, 0.0 }
 0x18e   :  { %179 = vadd.xlane.f32.xlu0 %v178_v16 }
 0x217   :  { %v180_v17 = vpop.xlane.xlu0 %179 }
 0x218   :  { %268 = vlog2.f32 %v180_v17 }
 0x225   :  { %v269_v18 = vpop.eup %268 }
 0x226   :  { %v182_v19 = vmul.f32 0.6931472, %v269_v18 }
 0x228   :  { %v183_v20 = vsub.f32 %v175_v13, %v182_v19 }
 0x22a   :  { %184 = vst [vmem:[#allocation6] sm:$0x3] %v183_v20 }
 0x22b   :  { %293 = shalt.err (!%p290_p11)
}
 0x22c   :  { %194 = dma.vmem_to_hbm [thread:$0]  %s192_s9, 32, %s381_s4, [#allocation7]  }
 0x22d   :  { %314 = dma.done.wait [#allocation7], 32  }
 0x22e   :  { %315 = vsyncadd [#allocation7], 4294967264 }
 0x22f   :  { %198 = vsyncpa [#allocation7], 1 }
 0x230   :  { %199 = vsyncmov [#allocation3] }
 0x233   :  { %s200_s12 = vpop.sfrf %199 }
 0x234   :  { %p229_p12 = scmp.ne.s32.totalorder %s200_s12, 0 }
 0x236   :  { %204 = shalt.err (%p229_p12)  }

</bundles_post_ra>
